<compile_context>
chip_gen: v7x
topology: tpu7x:2x2x1
jax: 0.10.0
libtpu: 0.0.40
codegen_flags: <defaults>
</compile_context>

<pallas_src>
import functools

import jax
import jax.numpy as jnp
from jax import lax
from jax.experimental import pallas as pl
from jax.experimental.pallas import tpu as pltpu

SIGMA_DATA = 1.0  # Karras preconditioning data std


def _round_up(x, m):
    return (x + m - 1) // m * m


# ----------------------------- Pallas kernel ------------------------------ #
def fused_sampler_kernel(tab_ref, noise_ref, w_tab_ref, bias_tab_ref, o_ref,
                         *, num_steps):
    """Fully fused Karras Euler sampler.  grid = (num_lane_tiles,).

    tab_ref      : SMEM (num_steps, 3) f32 -> per-step [A, Bc, sigma0]
    noise_ref    : VMEM (C, lane_tile)     -> initial noise tile
    w_tab_ref    : VMEM (num_steps, C, C)  -> per-step c_in[t] * W
    bias_tab_ref : VMEM (num_steps, C, 1)  -> per-step b + c_noise[t] * s
    o_ref        : VMEM (C, lane_tile)     -> final clamped sample, written once
    """
    # x = sigma_0 * noise
    x = tab_ref[0, 2] * noise_ref[...]

    def one_step(t, x):
        a_coef = tab_ref[t, 0]   # 1 + r - r*c_skip,  r = (sigma_next - sigma)/sigma
        b_coef = tab_ref[t, 1]   # -r*c_out
        # Synthetic denoise net: MXU channel mix (c_in folded into W_t) plus
        # sigma-conditioned bias (c_noise folded into bias_t), then tanh (EUP).
        h = jnp.dot(w_tab_ref[t], x, preferred_element_type=jnp.float32)
        h = jnp.tanh(h + bias_tab_ref[t])
        # Collapsed Euler step:  x_next = A*x + Bc*h
        return a_coef * x + b_coef * h

    if num_steps <= 32:
        # Fully unrolled: static ref indices, full LLO scheduler visibility.
        for t in range(num_steps):
            x = one_step(t, x)
    else:
        x = lax.fori_loop(0, num_steps, one_step, x)

    # DiffusionSampler.forward final clamp(-1, 1): single store of the result.
    o_ref[...] = jnp.clip(x, -1.0, 1.0)


# ------------------------------- JAX glue --------------------------------- #
def karras_schedule(num_steps, sigma_min=1e-4, sigma_max=3.0, rho=9.0):
    """KarrasSchedule.forward: num_steps sigmas (descending) + trailing 0."""
    rho_inv = 1.0 / rho
    steps = jnp.arange(num_steps, dtype=jnp.float32)
    denom = max(num_steps - 1, 1)  # guard num_steps == 1
    sigmas = (sigma_max ** rho_inv
              + (steps / denom) * (sigma_min ** rho_inv - sigma_max ** rho_inv)
              ) ** rho
    return jnp.concatenate([sigmas, jnp.zeros((1,), jnp.float32)])


def make_step_tables(w, b, s, num_steps):
    """Per-step tables.

    Returns:
      tab      : (num_steps, 3) f32  -> [A, Bc, sigma0]               (SMEM)
      w_tab    : (num_steps, C, C)   -> c_in[t] * W                   (VMEM)
      bias_tab : (num_steps, C, 1)   -> b + c_noise[t] * s            (VMEM)
    """
    sigmas = karras_schedule(num_steps)               # (num_steps + 1,)
    sig = sigmas[:-1]
    sig_next = sigmas[1:]
    var = sig * sig + SIGMA_DATA * SIGMA_DATA
    inv_std = 1.0 / jnp.sqrt(var)
    c_skip = (SIGMA_DATA * SIGMA_DATA) / var
    c_out = sig * SIGMA_DATA * inv_std
    c_in = inv_std
    c_noise = 0.25 * jnp.log(sig)                     # sigma=0 never indexed
    r = (sig_next - sig) / sig
    a_coef = 1.0 + r - r * c_skip
    b_coef = -r * c_out
    sigma0 = jnp.full_like(sig, sigmas[0])

    tab = jnp.stack([a_coef, b_coef, sigma0], axis=1).astype(jnp.float32)
    w_tab = (c_in[:, None, None] * w[None, :, :]).astype(jnp.float32)
    bias_tab = (b[None, :, :]
                + c_noise[:, None, None] * s[None, :, :]).astype(jnp.float32)
    return tab, w_tab, bias_tab


@functools.partial(jax.jit, static_argnames=("num_steps",))
def diffusion_sampler_forward(noise, w, b, s, num_steps):
    """Equivalent of DiffusionSampler.forward(noise) — one fused pallas_call."""
    B, C, T = noise.shape
    tab, w_tab, bias_tab = make_step_tables(w, b, s, num_steps)

    # Fold the batch dim into the lane axis: (B, C, T) -> (C, B*T).
    x_flat = jnp.transpose(noise, (1, 0, 2)).reshape(C, B * T)
    L = B * T
    lane_tile = min(_round_up(L, 128), 8192)          # lane-dense, <=8K lanes/tile
    L_pad = _round_up(L, lane_tile)
    if L_pad != L:
        x_flat = jnp.pad(x_flat, ((0, 0), (0, L_pad - L)))
    n_tiles = L_pad // lane_tile

    tile_bytes = C * lane_tile * 4
    vmem_limit = int(min(64 * 2**20, max(16 * 2**20, 8 * tile_bytes + 2**20)))

    kernel = functools.partial(fused_sampler_kernel, num_steps=num_steps)
    out_flat = pl.pallas_call(
        kernel,
        out_shape=jax.ShapeDtypeStruct((C, L_pad), jnp.float32),
        grid_spec=pltpu.PrefetchScalarGridSpec(
            num_scalar_prefetch=1,                    # per-step scalar table -> SMEM
            grid=(n_tiles,),
            in_specs=[
                pl.BlockSpec((C, lane_tile), lambda i, tab: (0, i)),          # noise
                pl.BlockSpec((num_steps, C, C), lambda i, tab: (0, 0, 0)),    # W_t
                pl.BlockSpec((num_steps, C, 1), lambda i, tab: (0, 0, 0)),    # bias_t
            ],
            out_specs=pl.BlockSpec((C, lane_tile), lambda i, tab: (0, i)),
        ),
        compiler_params=pltpu.CompilerParams(
            dimension_semantics=("parallel",),        # lane tiles are independent
            vmem_limit_bytes=vmem_limit),
    )(tab, x_flat, w_tab, bias_tab)

    out = out_flat[:, :L].reshape(C, B, T)
    return jnp.transpose(out, (1, 0, 2))


def diffusion_sampler_reference(noise, w, b, s, num_steps):
    """Pure-JAX reference, written exactly like the original (uncollapsed) math."""
    sigmas = karras_schedule(num_steps)
    x = sigmas[0] * noise
    for i in range(num_steps):
        sigma, sigma_next = sigmas[i], sigmas[i + 1]
        var = sigma * sigma + SIGMA_DATA * SIGMA_DATA
        c_in = 1.0 / jnp.sqrt(var)
        c_skip = (SIGMA_DATA * SIGMA_DATA) / var
        c_out = sigma * SIGMA_DATA / jnp.sqrt(var)
        c_noise = 0.25 * jnp.log(sigma)
        h = jnp.tanh(jnp.einsum("ij,bjt->bit", w, c_in * x)
                     + b[None] + c_noise * s[None])
        denoised = c_skip * x + c_out * h
        d = (x - denoised) / sigma
        x = x + (sigma_next - sigma) * d
    return jnp.clip(x, -1.0, 1.0)


# --------------------------------- main ------------------------------------ #
if __name__ == "__main__":
    B, C, T = 2, 8, 128      # batch, channels, time (NCW, like PyTorch)
    NUM_STEPS = 8

    key = jax.random.PRNGKey(0)
    k_noise, k_w, k_b, k_s = jax.random.split(key, 4)

    noise = jax.random.normal(k_noise, (B, C, T), dtype=jnp.float32)
    # deterministic synthetic "denoise network" parameters
    w = (jnp.eye(C, dtype=jnp.float32)
         + 0.05 * jax.random.normal(k_w, (C, C), dtype=jnp.float32))
    b = 0.01 * jax.random.normal(k_b, (C, 1), dtype=jnp.float32)
    s = 0.01 * jax.random.normal(k_s, (C, 1), dtype=jnp.float32)

    out = diffusion_sampler_forward(noise, w, b, s, NUM_STEPS)
    out = jax.block_until_ready(out)

    ref = diffusion_sampler_reference(noise, w, b, s, NUM_STEPS)

    assert out.shape == (B, C, T)
    assert bool(jnp.all(jnp.isfinite(out)))
    assert bool(jnp.all(out <= 1.0)) and bool(jnp.all(out >= -1.0))  # clamp
    assert bool(jnp.allclose(out, ref, rtol=1e-3, atol=1e-3))
    print("KERNEL_OK")
</pallas_src>

<mosaic_0001>
module attributes {stable_mosaic.version = 11 : i64} {
  func.func @fused_sampler_kernel(%arg0: i32, %arg1: memref<8x3xf32, #tpu.memory_space<smem>>, %arg2: memref<8x256xf32, #tpu.memory_space<vmem>>, %arg3: memref<8x8x8xf32, #tpu.memory_space<vmem>>, %arg4: memref<8x8x1xf32, #tpu.memory_space<vmem>>, %arg5: memref<8x256xf32, #tpu.memory_space<vmem>>) attributes {dimension_semantics = [#tpu.dimension_semantics<parallel>], iteration_bounds = array<i64: 1>, scalar_prefetch = 1 : i64, scratch_operands = 0 : i64, tpu.core_type = #tpu.core_type<tc>, window_params = [{transform_indices = @transform_0, window_bounds = array<i64: 8, 256>}, {pipeline_mode = #tpu.pipeline_mode<synchronous>, transform_indices = @transform_1, window_bounds = array<i64: 8, 8, 8>}, {pipeline_mode = #tpu.pipeline_mode<synchronous>, transform_indices = @transform_2, window_bounds = array<i64: 8, 8, 1>}, {transform_indices = @transform_3, window_bounds = array<i64: 8, 256>}]} {
    %c0 = arith.constant 0 : index
    %c2 = arith.constant 2 : index
    %0 = memref.load %arg1[%c0, %c2] : memref<8x3xf32, #tpu.memory_space<smem>>
    %c0_0 = arith.constant 0 : index
    %c0_1 = arith.constant 0 : index
    %1 = vector.load %arg2[%c0_0, %c0_1] : memref<8x256xf32, #tpu.memory_space<vmem>>, vector<8x256xf32>
    %2 = vector.broadcast %0 : f32 to vector<8x256xf32>
    %3 = arith.mulf %2, %1 : vector<8x256xf32>
    %c0_2 = arith.constant 0 : index
    %c0_3 = arith.constant 0 : index
    %4 = memref.load %arg1[%c0_2, %c0_3] : memref<8x3xf32, #tpu.memory_space<smem>>
    %c0_4 = arith.constant 0 : index
    %c1 = arith.constant 1 : index
    %5 = memref.load %arg1[%c0_4, %c1] : memref<8x3xf32, #tpu.memory_space<smem>>
    %c0_5 = arith.constant 0 : index
    %c0_6 = arith.constant 0 : index
    %c0_7 = arith.constant 0 : index
    %6 = vector.load %arg3[%c0_5, %c0_6, %c0_7] : memref<8x8x8xf32, #tpu.memory_space<vmem>>, vector<1x8x8xf32>
    %7 = vector.shape_cast %6 : vector<1x8x8xf32> to vector<8x8xf32>
    %cst = arith.constant dense<0.000000e+00> : vector<8x256xf32>
    %8 = tpu.matmul %7, %3, %cst {dimension_numbers = #tpu.dot_dimension_numbers<[1], [0], [0], [1], [0, 0, 1, 1], [], []>} : vector<8x8xf32>, vector<8x256xf32>, vector<8x256xf32> -> vector<8x256xf32>
    %c0_8 = arith.constant 0 : index
    %c0_9 = arith.constant 0 : index
    %c0_10 = arith.constant 0 : index
    %9 = vector.load %arg4[%c0_8, %c0_9, %c0_10] : memref<8x8x1xf32, #tpu.memory_space<vmem>>, vector<1x8x1xf32>
    %10 = vector.shape_cast %9 : vector<1x8x1xf32> to vector<8x1xf32>
    %11 = vector.broadcast %10 : vector<8x1xf32> to vector<8x256xf32>
    %12 = arith.addf %8, %11 : vector<8x256xf32>
    %13 = math.tanh %12 : vector<8x256xf32>
    %14 = vector.broadcast %4 : f32 to vector<8x256xf32>
    %15 = arith.mulf %14, %3 : vector<8x256xf32>
    %16 = vector.broadcast %5 : f32 to vector<8x256xf32>
    %17 = arith.mulf %16, %13 : vector<8x256xf32>
    %18 = arith.addf %15, %17 : vector<8x256xf32>
    %c1_11 = arith.constant 1 : index
    %c0_12 = arith.constant 0 : index
    %19 = memref.load %arg1[%c1_11, %c0_12] : memref<8x3xf32, #tpu.memory_space<smem>>
    %c1_13 = arith.constant 1 : index
    %c1_14 = arith.constant 1 : index
    %20 = memref.load %arg1[%c1_13, %c1_14] : memref<8x3xf32, #tpu.memory_space<smem>>
    %c1_15 = arith.constant 1 : index
    %c0_16 = arith.constant 0 : index
    %c0_17 = arith.constant 0 : index
    %21 = vector.load %arg3[%c1_15, %c0_16, %c0_17] : memref<8x8x8xf32, #tpu.memory_space<vmem>>, vector<1x8x8xf32>
    %22 = vector.shape_cast %21 : vector<1x8x8xf32> to vector<8x8xf32>
    %cst_18 = arith.constant dense<0.000000e+00> : vector<8x256xf32>
    %23 = tpu.matmul %22, %18, %cst_18 {dimension_numbers = #tpu.dot_dimension_numbers<[1], [0], [0], [1], [0, 0, 1, 1], [], []>} : vector<8x8xf32>, vector<8x256xf32>, vector<8x256xf32> -> vector<8x256xf32>
    %c1_19 = arith.constant 1 : index
    %c0_20 = arith.constant 0 : index
    %c0_21 = arith.constant 0 : index
    %24 = vector.load %arg4[%c1_19, %c0_20, %c0_21] : memref<8x8x1xf32, #tpu.memory_space<vmem>>, vector<1x8x1xf32>
    %25 = vector.shape_cast %24 : vector<1x8x1xf32> to vector<8x1xf32>
    %26 = vector.broadcast %25 : vector<8x1xf32> to vector<8x256xf32>
    %27 = arith.addf %23, %26 : vector<8x256xf32>
    %28 = math.tanh %27 : vector<8x256xf32>
    %29 = vector.broadcast %19 : f32 to vector<8x256xf32>
    %30 = arith.mulf %29, %18 : vector<8x256xf32>
    %31 = vector.broadcast %20 : f32 to vector<8x256xf32>
    %32 = arith.mulf %31, %28 : vector<8x256xf32>
    %33 = arith.addf %30, %32 : vector<8x256xf32>
    %c2_22 = arith.constant 2 : index
    %c0_23 = arith.constant 0 : index
    %34 = memref.load %arg1[%c2_22, %c0_23] : memref<8x3xf32, #tpu.memory_space<smem>>
    %c2_24 = arith.constant 2 : index
    %c1_25 = arith.constant 1 : index
    %35 = memref.load %arg1[%c2_24, %c1_25] : memref<8x3xf32, #tpu.memory_space<smem>>
    %c2_26 = arith.constant 2 : index
    %c0_27 = arith.constant 0 : index
    %c0_28 = arith.constant 0 : index
    %36 = vector.load %arg3[%c2_26, %c0_27, %c0_28] : memref<8x8x8xf32, #tpu.memory_space<vmem>>, vector<1x8x8xf32>
    %37 = vector.shape_cast %36 : vector<1x8x8xf32> to vector<8x8xf32>
    %cst_29 = arith.constant dense<0.000000e+00> : vector<8x256xf32>
    %38 = tpu.matmul %37, %33, %cst_29 {dimension_numbers = #tpu.dot_dimension_numbers<[1], [0], [0], [1], [0, 0, 1, 1], [], []>} : vector<8x8xf32>, vector<8x256xf32>, vector<8x256xf32> -> vector<8x256xf32>
    %c2_30 = arith.constant 2 : index
    %c0_31 = arith.constant 0 : index
    %c0_32 = arith.constant 0 : index
    %39 = vector.load %arg4[%c2_30, %c0_31, %c0_32] : memref<8x8x1xf32, #tpu.memory_space<vmem>>, vector<1x8x1xf32>
    %40 = vector.shape_cast %39 : vector<1x8x1xf32> to vector<8x1xf32>
    %41 = vector.broadcast %40 : vector<8x1xf32> to vector<8x256xf32>
    %42 = arith.addf %38, %41 : vector<8x256xf32>
    %43 = math.tanh %42 : vector<8x256xf32>
    %44 = vector.broadcast %34 : f32 to vector<8x256xf32>
    %45 = arith.mulf %44, %33 : vector<8x256xf32>
    %46 = vector.broadcast %35 : f32 to vector<8x256xf32>
    %47 = arith.mulf %46, %43 : vector<8x256xf32>
    %48 = arith.addf %45, %47 : vector<8x256xf32>
    %c3 = arith.constant 3 : index
    %c0_33 = arith.constant 0 : index
    %49 = memref.load %arg1[%c3, %c0_33] : memref<8x3xf32, #tpu.memory_space<smem>>
    %c3_34 = arith.constant 3 : index
    %c1_35 = arith.constant 1 : index
    %50 = memref.load %arg1[%c3_34, %c1_35] : memref<8x3xf32, #tpu.memory_space<smem>>
    %c3_36 = arith.constant 3 : index
    %c0_37 = arith.constant 0 : index
    %c0_38 = arith.constant 0 : index
    %51 = vector.load %arg3[%c3_36, %c0_37, %c0_38] : memref<8x8x8xf32, #tpu.memory_space<vmem>>, vector<1x8x8xf32>
    %52 = vector.shape_cast %51 : vector<1x8x8xf32> to vector<8x8xf32>
    %cst_39 = arith.constant dense<0.000000e+00> : vector<8x256xf32>
    %53 = tpu.matmul %52, %48, %cst_39 {dimension_numbers = #tpu.dot_dimension_numbers<[1], [0], [0], [1], [0, 0, 1, 1], [], []>} : vector<8x8xf32>, vector<8x256xf32>, vector<8x256xf32> -> vector<8x256xf32>
    %c3_40 = arith.constant 3 : index
    %c0_41 = arith.constant 0 : index
    %c0_42 = arith.constant 0 : index
    %54 = vector.load %arg4[%c3_40, %c0_41, %c0_42] : memref<8x8x1xf32, #tpu.memory_space<vmem>>, vector<1x8x1xf32>
    %55 = vector.shape_cast %54 : vector<1x8x1xf32> to vector<8x1xf32>
    %56 = vector.broadcast %55 : vector<8x1xf32> to vector<8x256xf32>
    %57 = arith.addf %53, %56 : vector<8x256xf32>
    %58 = math.tanh %57 : vector<8x256xf32>
    %59 = vector.broadcast %49 : f32 to vector<8x256xf32>
    %60 = arith.mulf %59, %48 : vector<8x256xf32>
    %61 = vector.broadcast %50 : f32 to vector<8x256xf32>
    %62 = arith.mulf %61, %58 : vector<8x256xf32>
    %63 = arith.addf %60, %62 : vector<8x256xf32>
    %c4 = arith.constant 4 : index
    %c0_43 = arith.constant 0 : index
    %64 = memref.load %arg1[%c4, %c0_43] : memref<8x3xf32, #tpu.memory_space<smem>>
    %c4_44 = arith.constant 4 : index
    %c1_45 = arith.constant 1 : index
    %65 = memref.load %arg1[%c4_44, %c1_45] : memref<8x3xf32, #tpu.memory_space<smem>>
    %c4_46 = arith.constant 4 : index
    %c0_47 = arith.constant 0 : index
    %c0_48 = arith.constant 0 : index
    %66 = vector.load %arg3[%c4_46, %c0_47, %c0_48] : memref<8x8x8xf32, #tpu.memory_space<vmem>>, vector<1x8x8xf32>
    %67 = vector.shape_cast %66 : vector<1x8x8xf32> to vector<8x8xf32>
    %cst_49 = arith.constant dense<0.000000e+00> : vector<8x256xf32>
    %68 = tpu.matmul %67, %63, %cst_49 {dimension_numbers = #tpu.dot_dimension_numbers<[1], [0], [0], [1], [0, 0, 1, 1], [], []>} : vector<8x8xf32>, vector<8x256xf32>, vector<8x256xf32> -> vector<8x256xf32>
    %c4_50 = arith.constant 4 : index
    %c0_51 = arith.constant 0 : index
    %c0_52 = arith.constant 0 : index
    %69 = vector.load %arg4[%c4_50, %c0_51, %c0_52] : memref<8x8x1xf32, #tpu.memory_space<vmem>>, vector<1x8x1xf32>
    %70 = vector.shape_cast %69 : vector<1x8x1xf32> to vector<8x1xf32>
    %71 = vector.broadcast %70 : vector<8x1xf32> to vector<8x256xf32>
    %72 = arith.addf %68, %71 : vector<8x256xf32>
    %73 = math.tanh %72 : vector<8x256xf32>
    %74 = vector.broadcast %64 : f32 to vector<8x256xf32>
    %75 = arith.mulf %74, %63 : vector<8x256xf32>
    %76 = vector.broadcast %65 : f32 to vector<8x256xf32>
    %77 = arith.mulf %76, %73 : vector<8x256xf32>
    %78 = arith.addf %75, %77 : vector<8x256xf32>
    %c5 = arith.constant 5 : index
    %c0_53 = arith.constant 0 : index
    %79 = memref.load %arg1[%c5, %c0_53] : memref<8x3xf32, #tpu.memory_space<smem>>
    %c5_54 = arith.constant 5 : index
    %c1_55 = arith.constant 1 : index
    %80 = memref.load %arg1[%c5_54, %c1_55] : memref<8x3xf32, #tpu.memory_space<smem>>
    %c5_56 = arith.constant 5 : index
    %c0_57 = arith.constant 0 : index
    %c0_58 = arith.constant 0 : index
    %81 = vector.load %arg3[%c5_56, %c0_57, %c0_58] : memref<8x8x8xf32, #tpu.memory_space<vmem>>, vector<1x8x8xf32>
    %82 = vector.shape_cast %81 : vector<1x8x8xf32> to vector<8x8xf32>
    %cst_59 = arith.constant dense<0.000000e+00> : vector<8x256xf32>
    %83 = tpu.matmul %82, %78, %cst_59 {dimension_numbers = #tpu.dot_dimension_numbers<[1], [0], [0], [1], [0, 0, 1, 1], [], []>} : vector<8x8xf32>, vector<8x256xf32>, vector<8x256xf32> -> vector<8x256xf32>
    %c5_60 = arith.constant 5 : index
    %c0_61 = arith.constant 0 : index
    %c0_62 = arith.constant 0 : index
    %84 = vector.load %arg4[%c5_60, %c0_61, %c0_62] : memref<8x8x1xf32, #tpu.memory_space<vmem>>, vector<1x8x1xf32>
    %85 = vector.shape_cast %84 : vector<1x8x1xf32> to vector<8x1xf32>
    %86 = vector.broadcast %85 : vector<8x1xf32> to vector<8x256xf32>
    %87 = arith.addf %83, %86 : vector<8x256xf32>
    %88 = math.tanh %87 : vector<8x256xf32>
    %89 = vector.broadcast %79 : f32 to vector<8x256xf32>
    %90 = arith.mulf %89, %78 : vector<8x256xf32>
    %91 = vector.broadcast %80 : f32 to vector<8x256xf32>
    %92 = arith.mulf %91, %88 : vector<8x256xf32>
    %93 = arith.addf %90, %92 : vector<8x256xf32>
    %c6 = arith.constant 6 : index
    %c0_63 = arith.constant 0 : index
    %94 = memref.load %arg1[%c6, %c0_63] : memref<8x3xf32, #tpu.memory_space<smem>>
    %c6_64 = arith.constant 6 : index
    %c1_65 = arith.constant 1 : index
    %95 = memref.load %arg1[%c6_64, %c1_65] : memref<8x3xf32, #tpu.memory_space<smem>>
    %c6_66 = arith.constant 6 : index
    %c0_67 = arith.constant 0 : index
    %c0_68 = arith.constant 0 : index
    %96 = vector.load %arg3[%c6_66, %c0_67, %c0_68] : memref<8x8x8xf32, #tpu.memory_space<vmem>>, vector<1x8x8xf32>
    %97 = vector.shape_cast %96 : vector<1x8x8xf32> to vector<8x8xf32>
    %cst_69 = arith.constant dense<0.000000e+00> : vector<8x256xf32>
    %98 = tpu.matmul %97, %93, %cst_69 {dimension_numbers = #tpu.dot_dimension_numbers<[1], [0], [0], [1], [0, 0, 1, 1], [], []>} : vector<8x8xf32>, vector<8x256xf32>, vector<8x256xf32> -> vector<8x256xf32>
    %c6_70 = arith.constant 6 : index
    %c0_71 = arith.constant 0 : index
    %c0_72 = arith.constant 0 : index
    %99 = vector.load %arg4[%c6_70, %c0_71, %c0_72] : memref<8x8x1xf32, #tpu.memory_space<vmem>>, vector<1x8x1xf32>
    %100 = vector.shape_cast %99 : vector<1x8x1xf32> to vector<8x1xf32>
    %101 = vector.broadcast %100 : vector<8x1xf32> to vector<8x256xf32>
    %102 = arith.addf %98, %101 : vector<8x256xf32>
    %103 = math.tanh %102 : vector<8x256xf32>
    %104 = vector.broadcast %94 : f32 to vector<8x256xf32>
    %105 = arith.mulf %104, %93 : vector<8x256xf32>
    %106 = vector.broadcast %95 : f32 to vector<8x256xf32>
    %107 = arith.mulf %106, %103 : vector<8x256xf32>
    %108 = arith.addf %105, %107 : vector<8x256xf32>
    %c7 = arith.constant 7 : index
    %c0_73 = arith.constant 0 : index
    %109 = memref.load %arg1[%c7, %c0_73] : memref<8x3xf32, #tpu.memory_space<smem>>
    %c7_74 = arith.constant 7 : index
    %c1_75 = arith.constant 1 : index
    %110 = memref.load %arg1[%c7_74, %c1_75] : memref<8x3xf32, #tpu.memory_space<smem>>
    %c7_76 = arith.constant 7 : index
    %c0_77 = arith.constant 0 : index
    %c0_78 = arith.constant 0 : index
    %111 = vector.load %arg3[%c7_76, %c0_77, %c0_78] : memref<8x8x8xf32, #tpu.memory_space<vmem>>, vector<1x8x8xf32>
    %112 = vector.shape_cast %111 : vector<1x8x8xf32> to vector<8x8xf32>
    %cst_79 = arith.constant dense<0.000000e+00> : vector<8x256xf32>
    %113 = tpu.matmul %112, %108, %cst_79 {dimension_numbers = #tpu.dot_dimension_numbers<[1], [0], [0], [1], [0, 0, 1, 1], [], []>} : vector<8x8xf32>, vector<8x256xf32>, vector<8x256xf32> -> vector<8x256xf32>
    %c7_80 = arith.constant 7 : index
    %c0_81 = arith.constant 0 : index
    %c0_82 = arith.constant 0 : index
    %114 = vector.load %arg4[%c7_80, %c0_81, %c0_82] : memref<8x8x1xf32, #tpu.memory_space<vmem>>, vector<1x8x1xf32>
    %115 = vector.shape_cast %114 : vector<1x8x1xf32> to vector<8x1xf32>
    %116 = vector.broadcast %115 : vector<8x1xf32> to vector<8x256xf32>
    %117 = arith.addf %113, %116 : vector<8x256xf32>
    %118 = math.tanh %117 : vector<8x256xf32>
    %119 = vector.broadcast %109 : f32 to vector<8x256xf32>
    %120 = arith.mulf %119, %108 : vector<8x256xf32>
    %121 = vector.broadcast %110 : f32 to vector<8x256xf32>
    %122 = arith.mulf %121, %118 : vector<8x256xf32>
    %123 = arith.addf %120, %122 : vector<8x256xf32>
    %cst_83 = arith.constant -1.000000e+00 : f32
    %cst_84 = arith.constant 1.000000e+00 : f32
    %124 = vector.broadcast %cst_83 : f32 to vector<8x256xf32>
    %125 = arith.maximumf %124, %123 : vector<8x256xf32>
    %126 = vector.broadcast %cst_84 : f32 to vector<8x256xf32>
    %127 = arith.minimumf %126, %125 : vector<8x256xf32>
    %c0_85 = arith.constant 0 : index
    %c0_86 = arith.constant 0 : index
    %128 = vector.load %arg5[%c0_85, %c0_86] : memref<8x256xf32, #tpu.memory_space<vmem>>, vector<8x256xf32>
    tpu.vector_store %arg5[%c0_85, %c0_86], %127 {strides = array<i32>} : memref<8x256xf32, #tpu.memory_space<vmem>>, vector<8x256xf32>,
    return
  }
  func.func @transform_0(%arg0: i32, %arg1: memref<8x3xf32, #tpu.memory_space<smem>>) -> (i32, i32) {
    %c0_i32 = arith.constant 0 : i32
    %c0_i32_0 = arith.constant 0 : i32
    return %c0_i32, %arg0 : i32, i32
  }
  func.func @transform_1(%arg0: i32, %arg1: memref<8x3xf32, #tpu.memory_space<smem>>) -> (i32, i32, i32) {
    %c0_i32 = arith.constant 0 : i32
    %c0_i32_0 = arith.constant 0 : i32
    %c0_i32_1 = arith.constant 0 : i32
    %c0_i32_2 = arith.constant 0 : i32
    return %c0_i32, %c0_i32_0, %c0_i32_1 : i32, i32, i32
  }
  func.func @transform_2(%arg0: i32, %arg1: memref<8x3xf32, #tpu.memory_space<smem>>) -> (i32, i32, i32) {
    %c0_i32 = arith.constant 0 : i32
    %c0_i32_0 = arith.constant 0 : i32
    %c0_i32_1 = arith.constant 0 : i32
    %c0_i32_2 = arith.constant 0 : i32
    return %c0_i32, %c0_i32_0, %c0_i32_1 : i32, i32, i32
  }
  func.func @transform_3(%arg0: i32, %arg1: memref<8x3xf32, #tpu.memory_space<smem>>) -> (i32, i32) {
    %c0_i32 = arith.constant 0 : i32
    %c0_i32_0 = arith.constant 0 : i32
    return %c0_i32, %arg0 : i32, i32
  }
}

</mosaic_0001>

<bundles_post_ra>
// kernel: diffusion_sampler_forward.1
= control target key start
LH: loop header
LB: loop body
LE: loop exit
PB: predicated region body
PF: predicated region fallthrough
CT: control target
= control target key end

     0   :  { %s1037_s0 = inlined_call_operand.vmem [shape: f32[8,3], index: 0, kind: input, shape index: {}]   ;;  %s1038_s1 = inlined_call_operand.vmem [shape: f32[8,256], index: 1, kind: input, shape index: {}]   ;;  %s1039_s2 = inlined_call_operand.vmem [shape: f32[8,8,8], index: 2, kind: input, shape index: {}]   ;;  %s1040_s3 = inlined_call_operand.vmem [shape: f32[8,8,1], index: 3, kind: input, shape index: {}]   ;;  %s1041_s4 = inlined_call_operand.hbm [shape: f32[8,256], index: 4, kind: output, shape index: {}]  }
   0x1   :  { %s9_s17 = sshll.u32 %s1037_s0, 4  ;;  %s10_s17 = int_to_ptr.vmem [resolvable:$true] %s9_s17 }
   0x2   :  { %s885_s18 = scalar_lea.vmem %s10_s17, 128  ;;  %p890_p1 = scmp.lt.s32.totalorder %s10_s17, %s10_s17 }
   0x3   :  { %p886_p0 = scmp.ne.s32.totalorder %s10_s17, %s885_s18  ;;  %p891_p2 = scmp.lt.s32.totalorder %s885_s18, %s885_s18 }
   0x5   :  { %p892_p3 = por %p891_p2, %p890_p1 }
   0x7   :  { %p893_p4 = pnand %p892_p3, %p886_p0 }
   0x9   :  { %896 = shalt.err (!%p893_p4)  }
   0xa   :  { %s923_s19 = smov [#allocation3]  }
   0xb   :  { %12 = dma.vmem_to_smem %s10_s17, 128, %s923_s19, [#allocation2] }
   0xc   :  { %919 = dma.done.wait [#allocation2], 128 }
   0xd   :  { %920 = vsyncadd [#allocation2], 4294967168 }
   0xe   :  { %14 = sfence }
   0xf   :  { %s807_s20 = sld [smem:[#allocation3 + $0x2]]  ;;  %v924_v0 = vmov 0.0   ;;  %v31_v1 = vld [vmem:[%s1040_s3] sm:$0xff]  ;;  %v925_v2 = vmov 0  }
  0x10   :  { %105 = vmatprep.mubr.f32.mxu0 %v924_v0  ;;  %200 = vmatprep.mubr.f32.mxu1 %v924_v0 }
  0x11   :  { %851 = vset.pattern.permute.xlu0 %v925_v2  ;;  %852 = vset.pattern.permute.xlu1 %v925_v2 }
  0x12   :  { %15 = vsyncpa [#allocation5], 0  ;;  %34 = vperm.xlu0 %851, %v31_v1   ;;  %v24_v3 = vld [vmem:[%s1038_s1 + $0x8] sm:$0xff]  ;;  %v23_v4 = vld [vmem:[%s1038_s1] sm:$0xff]  ;;  %vm37_vm0 = vcmask 64512   ;;  %s28_s7 = sld [smem:[#allocation3]] }
  0x13   :  { %v813_v5 = vld [vmem:[%s1040_s3 + $0x8] sm:$0xff]  ;;  %v30_v9 = vld [vmem:[%s1039_s2] sm:$0xff]  ;;  %v838_v11 = vld [vmem:[%s1040_s3 + $0x30] sm:$0xff]  ;;  %s808_s8 = sld [smem:[#allocation3 + $0x1]]  ;;  %s810_s19 = sld [smem:[#allocation3 + $0x80]] }
  0x14   :  { %v828_v10 = vld [vmem:[%s1040_s3 + $0x20] sm:$0xff]  ;;  %v812_v27 = vld [vmem:[%s1039_s2 + $0x8] sm:$0xff]  ;;  %v818_v28 = vld [vmem:[%s1040_s3 + $0x10] sm:$0xff]  ;;  %s815_s22 = sld [smem:[#allocation3 + $0x100]]  ;;  %s816_s0 = sld [smem:[#allocation3 + $0x101]] }
  0x15   :  { %v25_v6 = vstv %s807_s20  ;;  %225 = vperm.xlu1 %852, %v818_v28   ;;  %v823_v29 = vld [vmem:[%s1040_s3 + $0x18] sm:$0xff]  ;;  %v833_v30 = vld [vmem:[%s1040_s3 + $0x28] sm:$0xff]  ;;  %s811_s20 = sld [smem:[#allocation3 + $0x81]]  ;;  %v817_v47 = vld [vmem:[%s1039_s2 + $0x10] sm:$0xff]  ;;  %s820_s25 = sld [smem:[#allocation3 + $0x180]] }
  0x16   :  { %v27_v7 = vmul.f32 %v25_v6, %v24_v3  ;;  %v26_v8 = vmul.f32 %v25_v6, %v23_v4  ;;  %130 = vperm.xlu0 %851, %v813_v5   ;;  %v843_v31 = vld [vmem:[%s1040_s3 + $0x38] sm:$0xff]  ;;  %s821_s26 = sld [smem:[#allocation3 + $0x181]]  ;;  %s825_s29 = sld [smem:[#allocation3 + $0x200]] }
  0x17   :  { %v822_v63 = vld [vmem:[%s1039_s2 + $0x18] sm:$0xff]  ;;  %s826_s30 = sld [smem:[#allocation3 + $0x201]]  ;;  %s830_s6 = sld [smem:[#allocation3 + $0x280]] }
  0x18   :  { %41 = vmatprep.subr.mxu0 %v27_v7  ;;  %v114_v17 = vstv %s28_s7  ;;  %s831_s7 = sld [smem:[#allocation3 + $0x281]]  ;;  %s835_s10 = sld [smem:[#allocation3 + $0x300]] }
  0x19   :  { %42 = vmatpush1.msra.mxu0 %v26_v8  ;;  %v117_v18 = vstv %s808_s8  ;;  %v116_v20 = vmul.f32 %v114_v17, %v27_v7  ;;  %v115_v22 = vmul.f32 %v114_v17, %v26_v8  ;;  %320 = vperm.xlu1 %852, %v823_v29   ;;  %v209_v37 = vstv %s810_s19  ;;  %s836_s11 = sld [smem:[#allocation3 + $0x301]]  ;;  %s840_s14 = sld [smem:[#allocation3 + $0x380]] }
  0x1a   :  { %809 = vmatmul.mubr.msk.f32.vlgmr.msra.gmra.mrb[0].mxu0 %vm37_vm0, %v30_v9  ;;  %415 = vperm.xlu0 %851, %v828_v10   ;;  %v304_v53 = vstv %s815_s22  ;;  %v307_v54 = vstv %s816_s0  ;;  %s841_s15 = sld [smem:[#allocation3 + $0x381]] }
  0x1b   :  { %295 = vmatprep.mubr.f32.mxu0 %v924_v0  ;;  %v212_v38 = vstv %s811_s20  ;;  %v399_v6 = vstv %s820_s25 }
  0x1c   :  { %v402_v7 = vstv %s821_s26 }
  0x1d   :  { %510 = vperm.xlu1 %852, %v833_v30  }
  0x1e   :  { %605 = vperm.xlu0 %851, %v838_v11  }
  0x21   :  { %700 = vperm.xlu1 %852, %v843_v31  }
  0x91   :  { %v35_v12 = vpop.permute.xlu0 %34 }
  0x94   :  { %v226_v48 = vpop.permute.xlu1 %225 }
  0x95   :  { %v131_v32 = vpop.permute.xlu0 %130 }
  0x98   :  { %v321_v1 = vpop.permute.xlu1 %320 }
  0x99   :  { %v416_v17 = vpop.permute.xlu0 %415 }
  0xed   :  { %v107_v13 = vpop.f32.mrb[0].mxu0 }
  0xee   :  { %v108_v14 = vadd.f32 %v107_v13, %v35_v12  ;;  %v109_v15 = vpop.f32.mrb[1].mxu0 }
  0xef   :  { %v110_v16 = vadd.f32 %v109_v15, %v35_v12 }
  0xf0   :  { %853 = vtanh.f32 %v108_v14 }
  0xf1   :  { %855 = vtanh.f32 %v110_v16  ;;  %v827_v16 = vld [vmem:[%s1039_s2 + $0x20] sm:$0xff] }
  0xfa   :  { %v854_v19 = vpop.eup %853 }
  0xfb   :  { %v856_v21 = vpop.eup %855  ;;  %v118_v23 = vmul.f32 %v854_v19, %v117_v18 }
  0xfc   :  { %v119_v24 = vmul.f32 %v856_v21, %v117_v18 }
  0xfd   :  { %v120_v26 = vadd.f32 %v118_v23, %v115_v22  ;;  %v494_v22 = vstv %s825_s29  ;;  %v497_v23 = vstv %s826_s30 }
  0xfe   :  { %v121_v25 = vadd.f32 %v119_v24, %v116_v20 }
  0xff   :  { %v210_v41 = vmul.f32 %v209_v37, %v120_v26 }
 0x100   :  { %136 = vmatprep.subr.mxu1 %v121_v25  ;;  %v211_v43 = vmul.f32 %v209_v37, %v121_v25 }
 0x101   :  { %137 = vmatpush1.msra.mxu1 %v120_v26 }
 0x102   :  { %814 = vmatmul.mubr.msk.f32.vlgmr.msra.gmra.mrb[0].mxu1 %vm37_vm0, %v812_v27 }
 0x103   :  { %390 = vmatprep.mubr.f32.mxu1 %v924_v0 }
 0x1d5   :  { %v202_v33 = vpop.f32.mrb[0].mxu1 }
 0x1d6   :  { %v203_v34 = vadd.f32 %v202_v33, %v131_v32  ;;  %v204_v35 = vpop.f32.mrb[1].mxu1  ;;  %v511_v33 = vpop.permute.xlu1 %510 }
 0x1d7   :  { %v205_v36 = vadd.f32 %v204_v35, %v131_v32  ;;  %v832_v32 = vld [vmem:[%s1039_s2 + $0x28] sm:$0xff] }
 0x1d8   :  { %857 = vtanh.f32 %v203_v34 }
 0x1d9   :  { %859 = vtanh.f32 %v205_v36 }
 0x1e2   :  { %v858_v39 = vpop.eup %857 }
 0x1e3   :  { %v860_v40 = vpop.eup %859  ;;  %v213_v42 = vmul.f32 %v858_v39, %v212_v38  ;;  %v592_v39 = vstv %s831_s7 }
 0x1e4   :  { %v214_v44 = vmul.f32 %v860_v40, %v212_v38  ;;  %v589_v38 = vstv %s830_s6 }
 0x1e5   :  { %v215_v45 = vadd.f32 %v213_v42, %v210_v41 }
 0x1e6   :  { %v216_v46 = vadd.f32 %v214_v44, %v211_v43 }
 0x1e7   :  { %v305_v57 = vmul.f32 %v304_v53, %v215_v45 }
 0x1e8   :  { %231 = vmatprep.subr.mxu0 %v216_v46  ;;  %v306_v59 = vmul.f32 %v304_v53, %v216_v46  ;;  %v684_v53 = vstv %s835_s10 }
 0x1e9   :  { %232 = vmatpush1.msra.mxu0 %v215_v45 }
 0x1ea   :  { %819 = vmatmul.mubr.msk.f32.vlgmr.msra.gmra.mrb[2].mxu0 %vm37_vm0, %v817_v47 }
 0x1eb   :  { %485 = vmatprep.mubr.f32.mxu0 %v924_v0 }
 0x2bd   :  { %v297_v49 = vpop.f32.mrb[2].mxu0 }
 0x2be   :  { %v298_v50 = vadd.f32 %v297_v49, %v226_v48  ;;  %v299_v51 = vpop.f32.mrb[3].mxu0 }
 0x2bf   :  { %v300_v52 = vadd.f32 %v299_v51, %v226_v48  ;;  %v606_v48 = vpop.permute.xlu0 %605 }
 0x2c0   :  { %861 = vtanh.f32 %v298_v50 }
 0x2c1   :  { %863 = vtanh.f32 %v300_v52 }
 0x2ca   :  { %v862_v55 = vpop.eup %861 }
 0x2cb   :  { %v864_v56 = vpop.eup %863  ;;  %v308_v58 = vmul.f32 %v862_v55, %v307_v54 }
 0x2cc   :  { %v309_v60 = vmul.f32 %v864_v56, %v307_v54  ;;  %v687_v54 = vstv %s836_s11 }
 0x2cd   :  { %v310_v61 = vadd.f32 %v308_v58, %v305_v57 }
 0x2ce   :  { %v311_v62 = vadd.f32 %v309_v60, %v306_v59 }
 0x2cf   :  { %v400_v10 = vmul.f32 %v399_v6, %v310_v61 }
 0x2d0   :  { %326 = vmatprep.subr.mxu1 %v311_v62  ;;  %v401_v12 = vmul.f32 %v399_v6, %v311_v62  ;;  %v779_v6 = vstv %s840_s14 }
 0x2d1   :  { %327 = vmatpush1.msra.mxu1 %v310_v61 }
 0x2d2   :  { %824 = vmatmul.mubr.msk.f32.vlgmr.msra.gmra.mrb[2].mxu1 %vm37_vm0, %v822_v63  ;;  %v842_v63 = vld [vmem:[%s1039_s2 + $0x38] sm:$0xff] }
 0x2d3   :  { %580 = vmatprep.mubr.f32.mxu1 %v924_v0 }
 0x3a5   :  { %v392_v2 = vpop.f32.mrb[2].mxu1 }
 0x3a6   :  { %v393_v3 = vadd.f32 %v392_v2, %v321_v1  ;;  %v394_v4 = vpop.f32.mrb[3].mxu1 }
 0x3a7   :  { %v395_v5 = vadd.f32 %v394_v4, %v321_v1  ;;  %v701_v1 = vpop.permute.xlu1 %700 }
 0x3a8   :  { %865 = vtanh.f32 %v393_v3 }
 0x3a9   :  { %867 = vtanh.f32 %v395_v5 }
 0x3b2   :  { %v866_v8 = vpop.eup %865 }
 0x3b3   :  { %v868_v9 = vpop.eup %867  ;;  %v403_v11 = vmul.f32 %v866_v8, %v402_v7 }
 0x3b4   :  { %v404_v13 = vmul.f32 %v868_v9, %v402_v7  ;;  %v782_v7 = vstv %s841_s15 }
 0x3b5   :  { %v405_v14 = vadd.f32 %v403_v11, %v400_v10 }
 0x3b6   :  { %v406_v15 = vadd.f32 %v404_v13, %v401_v12 }
 0x3b7   :  { %v495_v26 = vmul.f32 %v494_v22, %v405_v14 }
 0x3b8   :  { %421 = vmatprep.subr.mxu0 %v406_v15  ;;  %v496_v28 = vmul.f32 %v494_v22, %v406_v15 }
 0x3b9   :  { %422 = vmatpush1.msra.mxu0 %v405_v14 }
 0x3ba   :  { %829 = vmatmul.mubr.msk.f32.vlgmr.msra.gmra.mrb[4].mxu0 %vm37_vm0, %v827_v16 }
 0x3bb   :  { %675 = vmatprep.mubr.f32.mxu0 %v924_v0 }
 0x48d   :  { %v487_v18 = vpop.f32.mrb[4].mxu0 }
 0x48e   :  { %v488_v19 = vadd.f32 %v487_v18, %v416_v17  ;;  %v489_v20 = vpop.f32.mrb[5].mxu0 }
 0x48f   :  { %v490_v21 = vadd.f32 %v489_v20, %v416_v17 }
 0x490   :  { %869 = vtanh.f32 %v488_v19 }
 0x491   :  { %871 = vtanh.f32 %v490_v21 }
 0x49a   :  { %v870_v24 = vpop.eup %869 }
 0x49b   :  { %v872_v25 = vpop.eup %871  ;;  %v498_v27 = vmul.f32 %v870_v24, %v497_v23 }
 0x49c   :  { %v499_v29 = vmul.f32 %v872_v25, %v497_v23 }
 0x49d   :  { %v500_v30 = vadd.f32 %v498_v27, %v495_v26 }
 0x49e   :  { %v501_v31 = vadd.f32 %v499_v29, %v496_v28 }
 0x49f   :  { %v590_v42 = vmul.f32 %v589_v38, %v500_v30 }
 0x4a0   :  { %516 = vmatprep.subr.mxu1 %v501_v31  ;;  %v591_v44 = vmul.f32 %v589_v38, %v501_v31 }
 0x4a1   :  { %517 = vmatpush1.msra.mxu1 %v500_v30 }
 0x4a2   :  { %834 = vmatmul.mubr.msk.f32.vlgmr.msra.gmra.mrb[4].mxu1 %vm37_vm0, %v832_v32 }
 0x4a3   :  { %770 = vmatprep.mubr.f32.mxu1 %v924_v0  ;;  %v837_v0 = vld [vmem:[%s1039_s2 + $0x30] sm:$0xff]  ;;  %s926_s2 = smov [#allocation4]  }
 0x4a4   :  { %s799_s16 = sshll.u32 %s926_s2, 4  ;;  %s800_s16 = int_to_ptr.vmem [resolvable:$true] %s799_s16 }
 0x4a5   :  { %s897_s17 = scalar_lea.vmem %s800_s16, 256  ;;  %p902_p6 = scmp.lt.s32.totalorder %s800_s16, %s800_s16 }
 0x4a6   :  { %p898_p5 = scmp.ne.s32.totalorder %s800_s16, %s897_s17  ;;  %p903_p7 = scmp.lt.s32.totalorder %s897_s17, %s897_s17 }
 0x4a8   :  { %p904_p8 = por %p903_p7, %p902_p6 }
 0x4aa   :  { %p905_p9 = pnand %p904_p8, %p898_p5 }
 0x575   :  { %v582_v34 = vpop.f32.mrb[4].mxu1 }
 0x576   :  { %v583_v35 = vadd.f32 %v582_v34, %v511_v33  ;;  %v584_v36 = vpop.f32.mrb[5].mxu1 }
 0x577   :  { %v585_v37 = vadd.f32 %v584_v36, %v511_v33 }
 0x578   :  { %873 = vtanh.f32 %v583_v35 }
 0x579   :  { %875 = vtanh.f32 %v585_v37 }
 0x582   :  { %v874_v40 = vpop.eup %873 }
 0x583   :  { %v876_v41 = vpop.eup %875  ;;  %v593_v43 = vmul.f32 %v874_v40, %v592_v39 }
 0x584   :  { %v594_v45 = vmul.f32 %v876_v41, %v592_v39 }
 0x585   :  { %v595_v46 = vadd.f32 %v593_v43, %v590_v42 }
 0x586   :  { %v596_v47 = vadd.f32 %v594_v45, %v591_v44 }
 0x587   :  { %v685_v57 = vmul.f32 %v684_v53, %v595_v46 }
 0x588   :  { %611 = vmatprep.subr.mxu0 %v596_v47  ;;  %v686_v59 = vmul.f32 %v684_v53, %v596_v47 }
 0x589   :  { %612 = vmatpush1.msra.mxu0 %v595_v46 }
 0x58a   :  { %839 = vmatmul.mubr.msk.f32.vlgmr.msra.gmra.mrb[6].mxu0 %vm37_vm0, %v837_v0 }
 0x65d   :  { %v677_v49 = vpop.f32.mrb[6].mxu0 }
 0x65e   :  { %v678_v50 = vadd.f32 %v677_v49, %v606_v48  ;;  %v679_v51 = vpop.f32.mrb[7].mxu0 }
 0x65f   :  { %v680_v52 = vadd.f32 %v679_v51, %v606_v48 }
 0x660   :  { %877 = vtanh.f32 %v678_v50 }
 0x661   :  { %879 = vtanh.f32 %v680_v52 }
 0x66a   :  { %v878_v55 = vpop.eup %877 }
 0x66b   :  { %v880_v56 = vpop.eup %879  ;;  %v688_v58 = vmul.f32 %v878_v55, %v687_v54 }
 0x66c   :  { %v689_v60 = vmul.f32 %v880_v56, %v687_v54 }
 0x66d   :  { %v690_v61 = vadd.f32 %v688_v58, %v685_v57 }
 0x66e   :  { %v691_v62 = vadd.f32 %v689_v60, %v686_v59 }
 0x66f   :  { %v780_v10 = vmul.f32 %v779_v6, %v690_v61 }
 0x670   :  { %706 = vmatprep.subr.mxu1 %v691_v62  ;;  %v781_v12 = vmul.f32 %v779_v6, %v691_v62 }
 0x671   :  { %707 = vmatpush1.msra.mxu1 %v690_v61 }
 0x672   :  { %844 = vmatmul.mubr.msk.f32.vlgmr.msra.gmra.mrb[6].mxu1 %vm37_vm0, %v842_v63 }
 0x745   :  { %v772_v2 = vpop.f32.mrb[6].mxu1 }
 0x746   :  { %v773_v3 = vadd.f32 %v772_v2, %v701_v1  ;;  %v774_v4 = vpop.f32.mrb[7].mxu1 }
 0x747   :  { %v775_v5 = vadd.f32 %v774_v4, %v701_v1 }
 0x748   :  { %881 = vtanh.f32 %v773_v3 }
 0x749   :  { %883 = vtanh.f32 %v775_v5 }
 0x752   :  { %v882_v8 = vpop.eup %881 }
 0x753   :  { %v884_v9 = vpop.eup %883  ;;  %v783_v11 = vmul.f32 %v882_v8, %v782_v7 }
 0x754   :  { %v784_v13 = vmul.f32 %v884_v9, %v782_v7 }
 0x755   :  { %v785_v14 = vadd.f32 %v783_v11, %v780_v10 }
 0x756   :  { %v786_v15 = vadd.f32 %v784_v13, %v781_v12 }
 0x757   :  { %v845_v16 = vclamps-f32 %v785_v14, 1.0 }
 0x758   :  { %v846_v17 = vclamps-f32 %v786_v15, 1.0 }
 0x759   :  { %791 = vst [vmem:[#allocation4] sm:$0xff] %v845_v16 }
 0x75a   :  { %792 = vst [vmem:[#allocation4 + $0x8] sm:$0xff] %v846_v17 }
 0x75b   :  { %908 = shalt.err (!%p905_p9)
}
 0x75c   :  { %s909_s20 = scalar_lea.hbm %s1041_s4, 256 }
 0x75d   :  { %p910_p10 = scmp.ne.s32.totalorder %s1041_s4, %s909_s20  ;;  %p913_p11 = scmp.lt.u32.totalorder %s909_s20, %s1041_s4 }
 0x75f   :  { %p915_p12 = pnand %p913_p11, %p910_p10 }
 0x761   :  { %918 = shalt.err (!%p915_p12)
}
 0x762   :  { %802 = dma.vmem_to_hbm [thread:$0]  %s800_s16, 256, %s1041_s4, [#allocation5]  }
 0x763   :  { %921 = dma.done.wait [#allocation5], 256  }
 0x764   :  { %922 = vsyncadd [#allocation5], 4294967040 }
 0x765   :  { %806 = vsyncpa [#allocation5], 1 }

</bundles_post_ra>
